<compile_context>
chip_gen: v7x
topology: tpu7x:2x2x1
jax: 0.10.0
libtpu: 0.0.40
codegen_flags: <defaults>
</compile_context>

<pallas_src>
import functools

import jax
import jax.numpy as jnp
from jax.experimental import pallas as pl
from jax.experimental.pallas import tpu as pltpu

_LANE = 128
_SUBLANE = 8


def _round_up(x, m):
    return ((x + m - 1) // m) * m


def _choose_tiles(n_nodes):
    """Pick (padded node count, node-row tile tn, adj-column/reduction tile tk).

    Constraints: tn multiple of 8 (or == padded N); tk multiple of 128 (or ==
    padded N).  Large tiles amortize the ~0.35us per-grid-step overhead.
    """
    if n_nodes <= 256:
        tn = _round_up(n_nodes, _SUBLANE)
        n_p = tn
    else:
        tn = 256
        n_p = _round_up(n_nodes, tn)
    if n_p <= 2048:
        tk = n_p                      # whole adj row strip in one reduction step
    else:
        tk = 512
        n_p = _round_up(n_p, tk)      # keeps n_p a multiple of tn
    return n_p, tn, tk


# ---------------------------------------------------------------------------
# Pallas kernel: one ChebConvolution (k=2) layer, optionally fused log_softmax
# ---------------------------------------------------------------------------

def _cheb_layer_kernel(x_rows_ref, x_cols_ref, adj_ref, w_ref, b_ref, out_ref,
                       tx1_acc, *, last_layer, num_valid_out):
    """Grid: (node-row tiles, reduction tiles over adj columns).

      x_rows_ref : [tn, Fin_p]       bf16  Tx_0 rows for this tile (constant over k)
      x_cols_ref : [tk, Fin_p]       bf16  x rows matching this adj column chunk
      adj_ref    : [tn, tk]          bf16  adjacency tile
      w_ref      : [2*Fin_p, Fout_p] bf16  stacked [W0; W1]
      b_ref      : [1, Fout_p]       f32
      out_ref    : [tn, Fout_p]      bf16 (hidden) / f32 (last layer)
      tx1_acc    : [tn, Fin_p]       f32 VMEM accumulator for adj @ x
    """
    k = pl.program_id(1)

    @pl.when(k == 0)
    def _():
        tx1_acc[...] = jnp.zeros_like(tx1_acc)

    # Partial Tx_1 = adj @ x for this column chunk (MXU, f32 accumulation).
    tx1_acc[...] += jnp.dot(adj_ref[...], x_cols_ref[...],
                            preferred_element_type=jnp.float32)

    @pl.when(k == pl.num_programs(1) - 1)
    def _():
        x_rows = x_rows_ref[...]
        # Fuse the two k=2 matmuls into a single MXU call: [Tx0 | Tx1] @ [W0; W1].
        stacked = jnp.concatenate(
            [x_rows, tx1_acc[...].astype(x_rows.dtype)], axis=1)
        out = jnp.dot(stacked, w_ref[...], preferred_element_type=jnp.float32)
        out = out + b_ref[...]
        if last_layer:
            # Fused row-wise log_softmax over the valid class lanes only.
            if num_valid_out < out_ref.shape[-1]:
                col = jax.lax.broadcasted_iota(jnp.int32, out.shape, 1)
                out = jnp.where(col < num_valid_out, out, -jnp.inf)
            m = jnp.max(out, axis=-1, keepdims=True)
            z = out - m
            lse = jnp.log(jnp.sum(jnp.exp(z), axis=-1, keepdims=True))
            out = z - lse
        else:
            out = jnp.maximum(out, 0.0)   # ReLU (eval mode: dropout = identity)
        out_ref[...] = out.astype(out_ref.dtype)


# ---------------------------------------------------------------------------
# Wrappers
# ---------------------------------------------------------------------------

def cheb_layer(h, adj, w_stacked, b, *, last_layer, num_valid_out, tn, tk,
               out_dtype):
    n_p, fin_p = h.shape
    fout_p = w_stacked.shape[1]
    assert n_p % tn == 0 and n_p % tk == 0
    grid = (n_p // tn, n_p // tk)
    kernel = functools.partial(_cheb_layer_kernel, last_layer=last_layer,
                               num_valid_out=num_valid_out)
    return pl.pallas_call(
        kernel,
        out_shape=jax.ShapeDtypeStruct((n_p, fout_p), out_dtype),
        grid_spec=pltpu.PrefetchScalarGridSpec(
            num_scalar_prefetch=0,
            grid=grid,
            in_specs=[
                pl.BlockSpec((tn, fin_p), lambda i, k: (i, 0)),          # Tx0 rows
                pl.BlockSpec((tk, fin_p), lambda i, k: (k, 0)),          # x col chunk
                pl.BlockSpec((tn, tk), lambda i, k: (i, k)),             # adj tile
                pl.BlockSpec((2 * fin_p, fout_p), lambda i, k: (0, 0)),  # [W0; W1]
                pl.BlockSpec((1, fout_p), lambda i, k: (0, 0)),          # bias
            ],
            out_specs=pl.BlockSpec((tn, fout_p), lambda i, k: (i, 0)),
            scratch_shapes=[pltpu.VMEM((tn, fin_p), jnp.float32)],
        ),
        compiler_params=pltpu.CompilerParams(
            dimension_semantics=("parallel", "arbitrary")),
    )(h, h, adj, w_stacked, b)


def _prep_layer_params(w0, w1, b, fin_p, fout_p, compute_dtype):
    """Zero-pad to lane-dense shapes and stack [W0; W1] along K."""
    fin, fout = w0.shape
    w = jnp.zeros((2 * fin_p, fout_p), jnp.float32)
    w = w.at[:fin, :fout].set(w0)
    w = w.at[fin_p:fin_p + fin, :fout].set(w1)
    b_p = jnp.zeros((1, fout_p), jnp.float32).at[0, :fout].set(b.reshape(-1))
    return w.astype(compute_dtype), b_p


def chebnet_forward(x, adj, params, *, compute_dtype=jnp.bfloat16):
    """Full ChebNet forward (eval mode: dropout = identity, with_bn=False)."""
    n, f0 = x.shape
    num_classes = params[-1][0].shape[1]
    n_p, tn, tk = _choose_tiles(n)

    f0_p = _round_up(f0, _LANE)
    h = jnp.zeros((n_p, f0_p), compute_dtype).at[:n, :f0].set(
        x.astype(compute_dtype))
    adj_p = jnp.zeros((n_p, n_p), compute_dtype).at[:n, :n].set(
        adj.astype(compute_dtype))

    n_layers = len(params)
    for ix, (w0, w1, b) in enumerate(params):
        fin, fout = w0.shape
        fin_p, fout_p = _round_up(fin, _LANE), _round_up(fout, _LANE)
        assert h.shape[1] == fin_p
        is_last = ix == n_layers - 1
        w_st, b_p = _prep_layer_params(w0, w1, b, fin_p, fout_p, compute_dtype)
        h = cheb_layer(h, adj_p, w_st, b_p,
                       last_layer=is_last,
                       num_valid_out=fout,
                       tn=tn, tk=tk,
                       out_dtype=jnp.float32 if is_last else compute_dtype)
    return h[:n, :num_classes]


# ---------------------------------------------------------------------------
# Deterministic parameter init (mirrors ChebConvolution.reset_parameters)
# ---------------------------------------------------------------------------

def xavier_uniform(key, fan_in, fan_out):
    bound = (6.0 / (fan_in + fan_out)) ** 0.5
    return jax.random.uniform(key, (fan_in, fan_out), jnp.float32, -bound, bound)


def make_params(key, num_features, hidden_dim, num_classes, nlayers=2, k=2):
    dims = [num_features] + [hidden_dim] * (nlayers - 1) + [num_classes]
    params = []
    for l in range(nlayers):
        fin, fout = dims[l], dims[l + 1]
        ws = []
        for _ in range(k):
            key, sub = jax.random.split(key)
            ws.append(xavier_uniform(sub, fin, fout))  # stored as [Fin, Fout]
        b = jnp.zeros((1, fout), jnp.float32)          # zeros(self.bias)
        params.append((ws[0], ws[1], b))
    return params


# ---------------------------------------------------------------------------
# References (plain JAX) for sanity checks
# ---------------------------------------------------------------------------

def chebnet_forward_ref_f32(x, adj, params):
    """Original eval-mode module semantics, pure f32."""
    h = x
    for ix, (w0, w1, b) in enumerate(params):
        out = h @ w0 + (adj @ h) @ w1 + b
        if ix != len(params) - 1:
            out = jnp.maximum(out, 0.0)
        h = out
    return jax.nn.log_softmax(h, axis=1)


def chebnet_forward_ref_mixed(x, adj, params, compute_dtype=jnp.bfloat16):
    """Reference mirroring the kernel's mixed precision (bf16 MXU operands, f32 accum)."""
    cdt = compute_dtype
    adj_c = adj.astype(cdt)
    h = x.astype(cdt)
    for ix, (w0, w1, b) in enumerate(params):
        tx1 = jnp.dot(adj_c, h, preferred_element_type=jnp.float32).astype(cdt)
        stacked = jnp.concatenate([h, tx1], axis=1)
        w = jnp.concatenate([w0, w1], axis=0).astype(cdt)
        out = jnp.dot(stacked, w, preferred_element_type=jnp.float32) + b
        if ix != len(params) - 1:
            h = jnp.maximum(out, 0.0).astype(cdt)
        else:
            h = out
    return jax.nn.log_softmax(h, axis=1)


if __name__ == "__main__":
    key = jax.random.PRNGKey(0)

    N = 64              # nodes
    num_features = 32
    hidden_dim = 32
    num_classes = 16

    k_x, k_a, k_p = jax.random.split(key, 3)

    x = jax.random.normal(k_x, (N, num_features), jnp.float32)

    # Symmetric-normalized dense adjacency with self-loops (deterministic).
    a = (jax.random.uniform(k_a, (N, N)) < 0.1).astype(jnp.float32)
    a = jnp.maximum(a, a.T) + jnp.eye(N, dtype=jnp.float32)
    deg = jnp.sum(a, axis=1)
    dinv = 1.0 / jnp.sqrt(deg)
    adj = a * dinv[:, None] * dinv[None, :]

    params = make_params(k_p, num_features, hidden_dim, num_classes, nlayers=2, k=2)

    out = chebnet_forward(x, adj, params)
    out = jax.block_until_ready(out)
    assert out.shape == (N, num_classes)

    # Strict check against a reference that mirrors the kernel's bf16/f32 scheme.
    ref_mp = chebnet_forward_ref_mixed(x, adj, params)
    assert jnp.allclose(out, ref_mp, atol=3e-3, rtol=3e-3), (
        float(jnp.max(jnp.abs(out - ref_mp))))
    # Loose check against the pure-f32 module semantics (bf16 quantization only).
    ref_f32 = chebnet_forward_ref_f32(x, adj, params)
    assert jnp.allclose(out, ref_f32, atol=1e-1, rtol=1e-1), (
        float(jnp.max(jnp.abs(out - ref_f32))))

    # TODO(synk): dropout / BatchNorm are training-time branches (with_bn=False
    # default); eval-mode forward implemented.  Chebyshev order k>2 recursion
    # (Tx_2 = 2*adj@Tx_1 - Tx_0) not implemented; module default k=2 is.
    print("KERNEL_OK")
</pallas_src>

<mosaic_0001>
module attributes {stable_mosaic.version = 11 : i64} {
  func.func @_cheb_layer_kernel(%arg0: i32, %arg1: i32, %arg2: memref<64x128xbf16, #tpu.memory_space<vmem>>, %arg3: memref<64x128xbf16, #tpu.memory_space<vmem>>, %arg4: memref<64x64xbf16, #tpu.memory_space<vmem>>, %arg5: memref<256x128xbf16, #tpu.memory_space<vmem>>, %arg6: memref<1x128xf32, #tpu.memory_space<vmem>>, %arg7: memref<64x128xbf16, #tpu.memory_space<vmem>>, %arg8: memref<64x128xf32, #tpu.memory_space<vmem>>) attributes {dimension_semantics = [#tpu.dimension_semantics<parallel>, #tpu.dimension_semantics<arbitrary>], iteration_bounds = array<i64: 1, 1>, scalar_prefetch = 0 : i64, scratch_operands = 1 : i64, tpu.core_type = #tpu.core_type<tc>, window_params = [{transform_indices = @transform_0, window_bounds = array<i64: 64, 128>}, {transform_indices = @transform_1, window_bounds = array<i64: 64, 128>}, {transform_indices = @transform_2, window_bounds = array<i64: 64, 64>}, {pipeline_mode = #tpu.pipeline_mode<synchronous>, transform_indices = @transform_3, window_bounds = array<i64: 256, 128>}, {pipeline_mode = #tpu.pipeline_mode<synchronous>, transform_indices = @transform_4, window_bounds = array<i64: 1, 128>}, {transform_indices = @transform_5, window_bounds = array<i64: 64, 128>}]} {
    %c0_i32 = arith.constant 0 : i32
    %0 = arith.cmpi eq, %arg1, %c0_i32 : i32
    %1 = arith.extui %0 : i1 to i32
    %c0_i32_0 = arith.constant 0 : i32
    %2 = arith.cmpi ne, %1, %c0_i32_0 : i32
    scf.if %2 {
      %cst_10 = arith.constant 0.000000e+00 : f32
      %12 = vector.broadcast %cst_10 : f32 to vector<64x128xf32>
      %c0_11 = arith.constant 0 : index
      %c0_12 = arith.constant 0 : index
      %13 = vector.load %arg8[%c0_11, %c0_12] : memref<64x128xf32, #tpu.memory_space<vmem>>, vector<64x128xf32>
      tpu.vector_store %arg8[%c0_11, %c0_12], %12 {strides = array<i32>} : memref<64x128xf32, #tpu.memory_space<vmem>>, vector<64x128xf32>,
    } else {
    }
    %c0 = arith.constant 0 : index
    %c0_1 = arith.constant 0 : index
    %3 = vector.load %arg8[%c0, %c0_1] : memref<64x128xf32, #tpu.memory_space<vmem>>, vector<64x128xf32>
    %c0_2 = arith.constant 0 : index
    %c0_3 = arith.constant 0 : index
    %4 = vector.load %arg4[%c0_2, %c0_3] : memref<64x64xbf16, #tpu.memory_space<vmem>>, vector<64x64xbf16>
    %c0_4 = arith.constant 0 : index
    %c0_5 = arith.constant 0 : index
    %5 = vector.load %arg3[%c0_4, %c0_5] : memref<64x128xbf16, #tpu.memory_space<vmem>>, vector<64x128xbf16>
    %cst = arith.constant dense<0.000000e+00> : vector<64x128xf32>
    %6 = tpu.matmul %4, %5, %cst {dimension_numbers = #tpu.dot_dimension_numbers<[1], [0], [0], [1], [0, 0, 1, 1], [], []>} : vector<64x64xbf16>, vector<64x128xbf16>, vector<64x128xf32> -> vector<64x128xf32>
    %7 = arith.addf %3, %6 : vector<64x128xf32>
    %c0_6 = arith.constant 0 : index
    %c0_7 = arith.constant 0 : index
    %8 = vector.load %arg8[%c0_6, %c0_7] : memref<64x128xf32, #tpu.memory_space<vmem>>, vector<64x128xf32>
    tpu.vector_store %arg8[%c0_6, %c0_7], %7 {strides = array<i32>} : memref<64x128xf32, #tpu.memory_space<vmem>>, vector<64x128xf32>,
    %c0_i32_8 = arith.constant 0 : i32
    %9 = arith.cmpi eq, %arg1, %c0_i32_8 : i32
    %10 = arith.extui %9 : i1 to i32
    %c0_i32_9 = arith.constant 0 : i32
    %11 = arith.cmpi ne, %10, %c0_i32_9 : i32
    scf.if %11 {
      %c0_10 = arith.constant 0 : index
      %c0_11 = arith.constant 0 : index
      %12 = vector.load %arg2[%c0_10, %c0_11] : memref<64x128xbf16, #tpu.memory_space<vmem>>, vector<64x128xbf16>
      %c0_12 = arith.constant 0 : index
      %c0_13 = arith.constant 0 : index
      %13 = vector.load %arg8[%c0_12, %c0_13] : memref<64x128xf32, #tpu.memory_space<vmem>>, vector<64x128xf32>
      %14 = arith.truncf %13 : vector<64x128xf32> to vector<64x128xbf16>
      %15 = tpu.concatenate %12, %14 in 1 : vector<64x128xbf16>, vector<64x128xbf16> -> vector<64x256xbf16>
      %c0_14 = arith.constant 0 : index
      %c0_15 = arith.constant 0 : index
      %16 = vector.load %arg5[%c0_14, %c0_15] : memref<256x128xbf16, #tpu.memory_space<vmem>>, vector<256x128xbf16>
      %cst_16 = arith.constant dense<0.000000e+00> : vector<64x128xf32>
      %17 = tpu.matmul %15, %16, %cst_16 {dimension_numbers = #tpu.dot_dimension_numbers<[1], [0], [0], [1], [0, 0, 1, 1], [], []>} : vector<64x256xbf16>, vector<256x128xbf16>, vector<64x128xf32> -> vector<64x128xf32>
      %c0_17 = arith.constant 0 : index
      %c0_18 = arith.constant 0 : index
      %18 = vector.load %arg6[%c0_17, %c0_18] : memref<1x128xf32, #tpu.memory_space<vmem>>, vector<1x128xf32>
      %19 = vector.broadcast %18 : vector<1x128xf32> to vector<64x128xf32>
      %20 = arith.addf %17, %19 : vector<64x128xf32>
      %cst_19 = arith.constant 0.000000e+00 : f32
      %21 = vector.broadcast %cst_19 : f32 to vector<64x128xf32>
      %22 = arith.maximumf %20, %21 : vector<64x128xf32>
      %23 = arith.truncf %22 : vector<64x128xf32> to vector<64x128xbf16>
      %c0_20 = arith.constant 0 : index
      %c0_21 = arith.constant 0 : index
      %24 = vector.load %arg7[%c0_20, %c0_21] : memref<64x128xbf16, #tpu.memory_space<vmem>>, vector<64x128xbf16>
      tpu.vector_store %arg7[%c0_20, %c0_21], %23 {strides = array<i32>} : memref<64x128xbf16, #tpu.memory_space<vmem>>, vector<64x128xbf16>,
    } else {
    }
    return
  }
  func.func @transform_0(%arg0: i32, %arg1: i32) -> (i32, i32) {
    %c0_i32 = arith.constant 0 : i32
    %c0_i32_0 = arith.constant 0 : i32
    return %arg0, %c0_i32 : i32, i32
  }
  func.func @transform_1(%arg0: i32, %arg1: i32) -> (i32, i32) {
    %c0_i32 = arith.constant 0 : i32
    %c0_i32_0 = arith.constant 0 : i32
    return %arg1, %c0_i32 : i32, i32
  }
  func.func @transform_2(%arg0: i32, %arg1: i32) -> (i32, i32) {
    %c0_i32 = arith.constant 0 : i32
    return %arg0, %arg1 : i32, i32
  }
  func.func @transform_3(%arg0: i32, %arg1: i32) -> (i32, i32) {
    %c0_i32 = arith.constant 0 : i32
    %c0_i32_0 = arith.constant 0 : i32
    %c0_i32_1 = arith.constant 0 : i32
    return %c0_i32, %c0_i32_0 : i32, i32
  }
  func.func @transform_4(%arg0: i32, %arg1: i32) -> (i32, i32) {
    %c0_i32 = arith.constant 0 : i32
    %c0_i32_0 = arith.constant 0 : i32
    %c0_i32_1 = arith.constant 0 : i32
    return %c0_i32, %c0_i32_0 : i32, i32
  }
  func.func @transform_5(%arg0: i32, %arg1: i32) -> (i32, i32) {
    %c0_i32 = arith.constant 0 : i32
    %c0_i32_0 = arith.constant 0 : i32
    return %arg0, %c0_i32 : i32, i32
  }
}

</mosaic_0001>

<bundles_post_ra>
// kernel: tpu_custom_call.1
= control target key start
LH: loop header
LB: loop body
LE: loop exit
PB: predicated region body
PF: predicated region fallthrough
CT: control target
= control target key end

     0   :  { %10 = vsyncpa [#allocation4], 0  ;;  %s1003_s0 = inlined_call_operand.hbm [shape: bf16[64,128], index: 0, kind: input, shape index: {}]   ;;  %s1004_s1 = inlined_call_operand.hbm [shape: bf16[64,128], index: 1, kind: input, shape index: {}]   ;;  %s1005_s2 = inlined_call_operand.hbm [shape: bf16[64,64], index: 2, kind: input, shape index: {}]   ;;  %s1006_s3 = inlined_call_operand.hbm [shape: bf16[256,128], index: 3, kind: input, shape index: {}]   ;;  %s1007_s4 = inlined_call_operand.vmem [shape: f32[1,128], index: 4, kind: input, shape index: {}]   ;;  %s1008_s5 = inlined_call_operand.hbm [shape: bf16[64,128], index: 5, kind: output, shape index: {}]  }
   0x1   :  { %11 = vsyncpa [#allocation7], 0 }
   0x2   :  { %12 = vsyncpa [#allocation10], 0 }
   0x3   :  { %13 = vsyncpa [#allocation5], 0  ;;  %s870_s18 = smov [#allocation6]   ;;  %s871_s20 = smov [#allocation3]  }
   0x4   :  { %s31_s19 = sshll.u32 %s870_s18, 4  ;;  %s19_s21 = sshll.u32 %s871_s20, 4  ;;  %s32_s19 = int_to_ptr.vmem [resolvable:$true] %s31_s19  ;;  %s907_s21 = int_to_ptr.vmem [resolvable:$true] %s19_s21 }
   0x5   :  { %s752_s24 = scalar_lea.hbm %s1004_s1, 512 }
   0x6   :  { %p753_p0 = scmp.ne.s32.totalorder %s1004_s1, %s752_s24  ;;  %p756_p1 = scmp.lt.u32.totalorder %s752_s24, %s1004_s1 }
   0x8   :  { %p758_p2 = pnand %p756_p1, %p753_p0 }
   0xa   :  { %761 = shalt.err (!%p758_p2)
}
   0xb   :  { %s762_s29 = scalar_lea.vmem %s32_s19, 512  ;;  %p767_p4 = scmp.lt.s32.totalorder %s32_s19, %s32_s19 }
   0xc   :  { %p763_p3 = scmp.ne.s32.totalorder %s32_s19, %s762_s29  ;;  %p768_p5 = scmp.lt.s32.totalorder %s762_s29, %s762_s29 }
   0xe   :  { %p769_p6 = por %p768_p5, %p767_p4 }
  0x10   :  { %p770_p7 = pnand %p769_p6, %p763_p3 }
  0x12   :  { %773 = shalt.err (!%p770_p7)
}
  0x13   :  { %s872_s30 = smov 64   ;;  %s873_s6 = smov 4  }
  0x14   :  { %37 = dma.hbm_to_vmem [thread:$0]  %s1004_s1, 512, %s32_s19, [#allocation7], %s872_s30, %s872_s30, %s873_s6  }
  0x15   :  { %s774_s11 = scalar_lea.hbm %s1003_s0, 512 }
  0x16   :  { %p775_p8 = scmp.ne.s32.totalorder %s1003_s0, %s774_s11  ;;  %p778_p9 = scmp.lt.u32.totalorder %s774_s11, %s1003_s0 }
  0x18   :  { %p780_p10 = pnand %p778_p9, %p775_p8 }
  0x1a   :  { %783 = shalt.err (!%p780_p10)
}
  0x1b   :  { %s784_s16 = scalar_lea.vmem %s907_s21, 512  ;;  %p789_p12 = scmp.lt.s32.totalorder %s907_s21, %s907_s21 }
  0x1c   :  { %p785_p11 = scmp.ne.s32.totalorder %s907_s21, %s784_s16  ;;  %p790_p13 = scmp.lt.s32.totalorder %s784_s16, %s784_s16 }
  0x1e   :  { %p791_p0 = por %p790_p13, %p789_p12 }
  0x20   :  { %p792_p1 = pnand %p791_p0, %p785_p11 }
  0x22   :  { %795 = shalt.err (!%p792_p1)
}
  0x23   :  { %25 = dma.hbm_to_vmem [thread:$0]  %s1003_s0, 512, %s907_s21, [#allocation4], %s872_s30, %s872_s30, %s873_s6  }
  0x24   :  { %s874_s18 = smov [#allocation8]   ;;  %s875_s20 = smov [#allocation9]  }
  0x25   :  { %s43_s19 = sshll.u32 %s874_s18, 4  ;;  %s55_s22 = sshll.u32 %s875_s20, 4  ;;  %s44_s19 = int_to_ptr.vmem [resolvable:$true] %s43_s19  ;;  %s944_s22 = int_to_ptr.vmem [resolvable:$true] %s55_s22 }
  0x26   :  { %s796_s25 = scalar_lea.hbm %s1005_s2, 512 }
  0x27   :  { %p797_p2 = scmp.ne.s32.totalorder %s1005_s2, %s796_s25  ;;  %p800_p3 = scmp.lt.u32.totalorder %s796_s25, %s1005_s2 }
  0x29   :  { %p802_p4 = pnand %p800_p3, %p797_p2 }
  0x2b   :  { %805 = shalt.err (!%p802_p4)
}
  0x2c   :  { %s806_s0 = scalar_lea.vmem %s44_s19, 512  ;;  %p811_p6 = scmp.lt.s32.totalorder %s44_s19, %s44_s19 }
  0x2d   :  { %p807_p5 = scmp.ne.s32.totalorder %s44_s19, %s806_s0  ;;  %p812_p7 = scmp.lt.s32.totalorder %s806_s0, %s806_s0 }
  0x2f   :  { %p813_p8 = por %p812_p7, %p811_p6 }
  0x31   :  { %p814_p9 = pnand %p813_p8, %p807_p5 }
  0x33   :  { %817 = shalt.err (!%p814_p9)
}
  0x34   :  { %49 = dma.hbm_to_vmem [thread:$0]  %s1005_s2, 512, %s44_s19, [#allocation7], %s872_s30, %s872_s30, %s873_s6  }
  0x35   :  { %s818_s10 = scalar_lea.hbm %s1006_s3, 2048 }
  0x36   :  { %p819_p10 = scmp.ne.s32.totalorder %s1006_s3, %s818_s10  ;;  %p822_p11 = scmp.lt.u32.totalorder %s818_s10, %s1006_s3 }
  0x38   :  { %p824_p12 = pnand %p822_p11, %p819_p10 }
  0x3a   :  { %827 = shalt.err (!%p824_p12)
}
  0x3b   :  { %s828_s15 = scalar_lea.vmem %s944_s22, 2048  ;;  %p833_p0 = scmp.lt.s32.totalorder %s944_s22, %s944_s22 }
  0x3c   :  { %p829_p13 = scmp.ne.s32.totalorder %s944_s22, %s828_s15  ;;  %p834_p1 = scmp.lt.s32.totalorder %s828_s15, %s828_s15 }
  0x3e   :  { %p835_p2 = por %p834_p1, %p833_p0 }
  0x40   :  { %p836_p3 = pnand %p835_p2, %p829_p13 }
  0x42   :  { %839 = shalt.err (!%p836_p3)
}
  0x43   :  { %61 = dma.hbm_to_vmem [thread:$0]  %s1006_s3, 2048, %s944_s22, [#allocation10], %s872_s30, %s872_s30, %s873_s6  }
  0x44   :  { %862 = dma.done.wait [#allocation4], 512  }
  0x45   :  { %863 = vsyncadd [#allocation4], 4294966784 }
  0x46   :  { %864 = dma.done.wait [#allocation7], 1024  }
  0x47   :  { %865 = vsyncadd [#allocation7], 4294966272 }
  0x48   :  { %866 = dma.done.wait [#allocation10], 2048  }
  0x49   :  { %867 = vsyncadd [#allocation10], 4294965248  ;;  %v724_v0 = vld [vmem:[#allocation6] sm:$0xff]   ;;  %v725_v1 = vld [vmem:[#allocation6 + $0x8] sm:$0xff]   ;;  %vm157_vm0 = vcmask 523264  }
  0x4a   :  { %685 = vmatprep.subr.bf16.mxu0 %v724_v0  ;;  %v726_v2 = vld [vmem:[#allocation6 + $0x10] sm:$0xff]   ;;  %v728_v3 = vld [vmem:[#allocation8] sm:$0xff]   ;;  %v727_v4 = vld [vmem:[#allocation6 + $0x18] sm:$0xff]  }
  0x4b   :  { %686 = vmatpush3.bf16.msra.mxu0 %v724_v0  ;;  %693 = vmatprep.mubr.msk.bf16.mxu0 %vm157_vm0, %v728_v3  ;;  %v732_v5 = vld [vmem:[#allocation9 + $0x40] sm:$0xff]   ;;  %v734_v7 = vld [vmem:[#allocation9 + $0x48] sm:$0xff]   ;;  %v736_v9 = vld [vmem:[#allocation9 + $0x50] sm:$0xff]  }
  0x4c   :  { %687 = vmatprep.subr.bf16.mxu0 %v725_v1  ;;  %v733_v6 = vld [vmem:[#allocation9] sm:$0xff]   ;;  %701 = vmatprep.subr.bf16.mxu1 %v732_v5  ;;  %v735_v8 = vld [vmem:[#allocation9 + $0x8] sm:$0xff]   ;;  %v730_v11 = vld [vmem:[#allocation8 + $0x10] sm:$0xff]  }
  0x4d   :  { %709 = vmatpush3.bf16.msra.mxu1 %v733_v6  ;;  %v729_v10 = vld [vmem:[#allocation8 + $0x8] sm:$0xff]   ;;  %v737_v12 = vld [vmem:[#allocation9 + $0x10] sm:$0xff]   ;;  %v738_v13 = vld [vmem:[#allocation9 + $0x58] sm:$0xff]  }
  0x4e   :  { %702 = vmatprep.subr.bf16.mxu1 %v734_v7  ;;  %v739_v14 = vld [vmem:[#allocation9 + $0x18] sm:$0xff]   ;;  %v740_v16 = vld [vmem:[#allocation9 + $0x60] sm:$0xff]   ;;  %v742_v18 = vld [vmem:[#allocation9 + $0x68] sm:$0xff]  }
  0x4f   :  { %688 = vmatpush3.bf16.msra.mxu0 %v725_v1  ;;  %v731_v15 = vld [vmem:[#allocation8 + $0x18] sm:$0xff]   ;;  %v741_v17 = vld [vmem:[#allocation9 + $0x20] sm:$0xff]   ;;  %v743_v19 = vld [vmem:[#allocation9 + $0x28] sm:$0xff]  }
  0x50   :  { %689 = vmatprep.subr.bf16.mxu0 %v726_v2  ;;  %v744_v20 = vld [vmem:[#allocation9 + $0x70] sm:$0xff]   ;;  %v746_v22 = vld [vmem:[#allocation9 + $0x78] sm:$0xff]   ;;  %v748_v27 = vld [vmem:[#allocation3 + $0x8] sm:$0xff]  }
  0x51   :  { %710 = vmatpush3.bf16.msra.mxu1 %v735_v8  ;;  %v745_v21 = vld [vmem:[#allocation9 + $0x30] sm:$0xff]   ;;  %v747_v23 = vld [vmem:[#allocation9 + $0x38] sm:$0xff]   ;;  %v750_v30 = vld [vmem:[#allocation3] sm:$0xff]  }
  0x52   :  { %703 = vmatprep.subr.bf16.mxu1 %v736_v9  ;;  %v749_v37 = vld [vmem:[#allocation3 + $0x10] sm:$0xff]   ;;  %v751_v39 = vld [vmem:[#allocation3 + $0x18] sm:$0xff]   ;;  %v581_v41 = vld [vmem:[%s1007_s4] ss:$0 sm:$0xff]  ;;  %s876_s4 = smov [#allocation11]  }
  0x53   :  { %690 = vmatpush3.bf16.msra.mxu0 %v726_v2  ;;  %s551_s17 = sshll.u32 %s876_s4, 4  ;;  %s552_s17 = int_to_ptr.vmem [resolvable:$true] %s551_s17 }
  0x54   :  { %691 = vmatprep.subr.bf16.mxu0 %v727_v4  ;;  %s840_s18 = scalar_lea.vmem %s552_s17, 512  ;;  %p845_p5 = scmp.lt.s32.totalorder %s552_s17, %s552_s17 }
  0x55   :  { %711 = vmatpush3.bf16.msra.mxu1 %v737_v12  ;;  %p841_p4 = scmp.ne.s32.totalorder %s552_s17, %s840_s18  ;;  %p846_p6 = scmp.lt.s32.totalorder %s840_s18, %s840_s18 }
  0x56   :  { %704 = vmatprep.subr.bf16.mxu1 %v738_v13 }
  0x57   :  { %692 = vmatpush3.bf16.msra.mxu0 %v727_v4  ;;  %p847_p7 = por %p846_p6, %p845_p5 }
  0x58   :  { %645 = vmatprep.subr.bf16.mxu0 %v732_v5 }
  0x59   :  { %712 = vmatpush3.bf16.msra.mxu1 %v739_v14  ;;  %p848_p8 = pnand %p847_p7, %p841_p4 }
  0x5a   :  { %694 = vmatmul.mubr.msk.bf16.vlgmr.msra.gmra.mrb[0].mxu0 %vm157_vm0, %v729_v10  ;;  %705 = vmatprep.subr.bf16.mxu1 %v740_v16 }
  0x5b   :  { %697 = vmatprep.mubr.msk.bf16.mxu0 %vm157_vm0, %v730_v11  ;;  %646 = vmatpush3.bf16.msra.mxu0 %v733_v6 }
  0x5c   :  { %647 = vmatprep.subr.bf16.mxu0 %v734_v7 }
  0x5d   :  { %713 = vmatpush3.bf16.msra.mxu1 %v741_v17 }
  0x5e   :  { %706 = vmatprep.subr.bf16.mxu1 %v742_v18 }
  0x5f   :  { %648 = vmatpush3.bf16.msra.mxu0 %v735_v8 }
  0x60   :  { %649 = vmatprep.subr.bf16.mxu0 %v736_v9 }
  0x61   :  { %714 = vmatpush3.bf16.msra.mxu1 %v743_v19 }
  0x62   :  { %698 = vmatmul.mubr.msk.bf16.gmra.mrb[4].mxu0 %vm157_vm0, %v731_v15  ;;  %707 = vmatprep.subr.bf16.mxu1 %v744_v20 }
  0x63   :  { %650 = vmatpush3.bf16.msra.mxu0 %v737_v12 }
  0x64   :  { %651 = vmatprep.subr.bf16.mxu0 %v738_v13 }
  0x65   :  { %715 = vmatpush3.bf16.msra.mxu1 %v745_v21 }
  0x66   :  { %708 = vmatprep.subr.bf16.mxu1 %v746_v22 }
  0x67   :  { %652 = vmatpush3.bf16.msra.mxu0 %v739_v14 }
  0x68   :  { %653 = vmatprep.subr.bf16.mxu0 %v740_v16 }
  0x69   :  { %716 = vmatpush3.bf16.msra.mxu1 %v747_v23 }
  0x6b   :  { %654 = vmatpush3.bf16.msra.mxu0 %v741_v17 }
  0x6c   :  { %655 = vmatprep.subr.bf16.mxu0 %v742_v18 }
  0x6f   :  { %656 = vmatpush3.bf16.msra.mxu0 %v743_v19 }
  0x70   :  { %657 = vmatprep.subr.bf16.mxu0 %v744_v20 }
  0x73   :  { %658 = vmatpush3.bf16.msra.mxu0 %v745_v21 }
  0x74   :  { %659 = vmatprep.subr.bf16.mxu0 %v746_v22 }
  0x77   :  { %660 = vmatpush3.bf16.msra.mxu0 %v747_v23 }
 0x12d   :  { %v695_v24 = vpop.f32.mrb[0].mxu0 }
 0x12e   :  { %v204_v25 = vpop.f32.mrb[1].mxu0 }
 0x12f   :  { %v696_v26 = vpop.f32.mrb[2].mxu0 }
 0x130   :  { %v207_v28 = vpop.f32.mrb[3].mxu0  ;;  %v271_v29 = vpack.c.bf16 %v696_v26, %v695_v24 }
 0x131   :  { %v270_v31 = vpack.c.bf16 %v207_v28, %v204_v25 }
 0x132   :  { %473 = vmatprep.mubr.bf16.mxu1 %v271_v29 }
 0x133   :  { %465 = vmatprep.mubr.bf16.mxu0 %v270_v31  ;;  %474 = vmatmul.mubr.bf16.vlgmr.msra.gmra.mrb[0].mxu1 %v748_v27 }
 0x134   :  { %466 = vmatmul.mubr.bf16.vlgmr.msra.gmra.mrb[8].mxu0 %v750_v30 }
 0x135   :  { %v699_v32 = vpop.f32.mrb[4].mxu0 }
 0x136   :  { %v220_v33 = vpop.f32.mrb[5].mxu0 }
 0x137   :  { %v700_v34 = vpop.f32.mrb[6].mxu0 }
 0x138   :  { %v273_v35 = vpack.c.bf16 %v700_v34, %v699_v32  ;;  %v223_v36 = vpop.f32.mrb[7].mxu0 }
 0x139   :  { %v272_v38 = vpack.c.bf16 %v223_v36, %v220_v33 }
 0x13b   :  { %481 = vmatprep.mubr.bf16.mxu1 %v272_v38 }
 0x13c   :  { %482 = vmatmul.mubr.bf16.gmra.mrb[4].mxu1 %v749_v37 }
 0x13d   :  { %489 = vmatprep.mubr.bf16.mxu1 %v273_v35 }
 0x144   :  { %490 = vmatmul.mubr.bf16.gmra.mrb[8].mxu1 %v751_v39 }
 0x206   :  { %v667_v40 = vpop.f32.mrb[0].mxu1 }
 0x207   :  { %v668_v42 = vpop.f32.mrb[1].mxu1  ;;  %v661_v43 = vpop.f32.mrb[8].mxu0 }
 0x208   :  { %v669_v44 = vadd.f32 %v668_v42, %v667_v40  ;;  %v670_v45 = vpop.f32.mrb[2].mxu1  ;;  %v662_v46 = vpop.f32.mrb[9].mxu0 }
 0x209   :  { %v671_v47 = vpop.f32.mrb[3].mxu1  ;;  %v663_v48 = vadd.f32 %v662_v46, %v661_v43  ;;  %v664_v49 = vpop.f32.mrb[10].mxu0 }
 0x20a   :  { %v476_v50 = vadd.f32 %v669_v44, %v581_v41  ;;  %v672_v51 = vadd.f32 %v671_v47, %v670_v45  ;;  %v665_v52 = vpop.f32.mrb[11].mxu0 }
 0x20b   :  { %v468_v53 = vadd.f32 %v663_v48, %v581_v41  ;;  %v666_v54 = vadd.f32 %v665_v52, %v664_v49 }
 0x20c   :  { %v479_v55 = vadd.f32 %v672_v51, %v581_v41  ;;  %v500_v58 = vmax.f32 %v476_v50, 0.0 }
 0x20d   :  { %v498_v56 = vmax.f32 %v468_v53, 0.0  ;;  %v471_v57 = vadd.f32 %v666_v54, %v581_v41 }
 0x20e   :  { %v501_v59 = vmax.f32 %v479_v55, 0.0 }
 0x20f   :  { %v673_v60 = vpop.f32.mrb[4].mxu1  ;;  %v499_v61 = vmax.f32 %v471_v57, 0.0 }
 0x210   :  { %v622_v62 = vpack.c.bf16 %v501_v59, %v500_v58  ;;  %v674_v63 = vpop.f32.mrb[5].mxu1 }
 0x211   :  { %v675_v0 = vadd.f32 %v674_v63, %v673_v60  ;;  %v676_v1 = vpop.f32.mrb[6].mxu1  ;;  %v617_v2 = vpack.c.bf16 %v499_v61, %v498_v56 }
 0x212   :  { %634 = vst [vmem:[#allocation11 + $0x8] sm:$0xff] %v622_v62   ;;  %v677_v3 = vpop.f32.mrb[7].mxu1 }
 0x213   :  { %v484_v4 = vadd.f32 %v675_v0, %v581_v41  ;;  %v678_v5 = vadd.f32 %v677_v3, %v676_v1  ;;  %618 = vst [vmem:[#allocation11] sm:$0xff] %v617_v2  }
 0x215   :  { %v487_v6 = vadd.f32 %v678_v5, %v581_v41  ;;  %v502_v7 = vmax.f32 %v484_v4, 0.0 }
 0x217   :  { %v503_v8 = vmax.f32 %v487_v6, 0.0  ;;  %v679_v9 = vpop.f32.mrb[8].mxu1 }
 0x218   :  { %v680_v10 = vpop.f32.mrb[9].mxu1 }
 0x219   :  { %v627_v11 = vpack.c.bf16 %v503_v8, %v502_v7  ;;  %v681_v12 = vadd.f32 %v680_v10, %v679_v9  ;;  %v682_v13 = vpop.f32.mrb[10].mxu1 }
 0x21a   :  { %v683_v14 = vpop.f32.mrb[11].mxu1 }
 0x21b   :  { %635 = vst [vmem:[#allocation11 + $0x10] sm:$0xff] %v627_v11   ;;  %v492_v15 = vadd.f32 %v681_v12, %v581_v41  ;;  %v684_v16 = vadd.f32 %v683_v14, %v682_v13 }
 0x21d   :  { %v495_v17 = vadd.f32 %v684_v16, %v581_v41  ;;  %v504_v18 = vmax.f32 %v492_v15, 0.0 }
 0x21f   :  { %v505_v19 = vmax.f32 %v495_v17, 0.0 }
 0x221   :  { %v632_v20 = vpack.c.bf16 %v505_v19, %v504_v18 }
 0x223   :  { %636 = vst [vmem:[#allocation11 + $0x18] sm:$0xff] %v632_v20  }
 0x224   :  { %851 = shalt.err (!%p848_p8)
}
 0x225   :  { %s852_s22 = scalar_lea.hbm %s1008_s5, 512 }
 0x226   :  { %p853_p9 = scmp.ne.s32.totalorder %s1008_s5, %s852_s22  ;;  %p856_p10 = scmp.lt.u32.totalorder %s852_s22, %s1008_s5 }
 0x228   :  { %p858_p11 = pnand %p856_p10, %p853_p9 }
 0x22a   :  { %861 = shalt.err (!%p858_p11)
}
 0x22b   :  { %557 = dma.vmem_to_hbm [thread:$0]  %s552_s17, 512, %s1008_s5, [#allocation5], %s872_s30, %s872_s30, %s873_s6  }
 0x22c   :  { %868 = dma.done.wait [#allocation5], 512  }
 0x22d   :  { %869 = vsyncadd [#allocation5], 4294966784 }
 0x22e   :  { %561 = vsyncpa [#allocation4], 1 }
 0x22f   :  { %562 = vsyncpa [#allocation7], 1 }
 0x230   :  { %563 = vsyncpa [#allocation10], 1 }
 0x231   :  { %564 = vsyncpa [#allocation5], 1 }

</bundles_post_ra>
